<compile_context>
chip_gen: v7x
topology: tpu7x:2x2x1
jax: 0.10.0
libtpu: 0.0.40
codegen_flags: <defaults>
</compile_context>

<pallas_src>
import functools

import jax
import jax.numpy as jnp
from jax.experimental import pallas as pl
from jax.experimental.pallas import tpu as pltpu

BLK = 8  # samples packed per row (= sublane count); 8 * head_dim lanes out


def _spatial_encoder_kernel(x_ref, w1_ref, b1_ref, w2_ref, b2_ref, o_ref):
    # x_ref : (tile_m, 2*BLK)              8 (x,y) samples packed per row
    # w1_ref: (2*BLK, BLK*H)               block-diagonal kron(I_8, W1)
    # b1_ref: (1, BLK*H)                   tiled b1
    # w2_ref: (BLK*H, BLK*D)               block-diagonal kron(I_8, W2)
    # b2_ref: (1, BLK*D)                   tiled b2
    # o_ref : (tile_m, BLK*D)              8 packed outputs per row (lane-dense)
    x = x_ref[...]
    h = jnp.dot(x, w1_ref[...], preferred_element_type=jnp.float32) + b1_ref[...]
    h = jnp.maximum(h, 0.0)  # ReLU
    y = jnp.dot(h, w2_ref[...], preferred_element_type=jnp.float32) + b2_ref[...]
    o_ref[...] = y.astype(o_ref.dtype)


@functools.partial(jax.jit, static_argnames=("tile_n",))
def spatial_encoder(state, w1, b1, w2, b2, *, tile_n=16384):
    """state: (..., 2) -> (..., head_dim). Equivalent to the PyTorch module."""
    *lead, two = state.shape
    assert two == 2, "last axis of state must be 2 (x, y coordinates)"
    hidden_dim = w1.shape[1]
    head_dim = w2.shape[1]

    x = state.reshape(-1, 2)
    n = x.shape[0]

    # Pack BLK samples per row.  Only pad when n is not a multiple of BLK
    # (pads just the tiny input; no output-side pad/slice in the common case).
    n_pad = -n % BLK
    if n_pad:
        x = jnp.pad(x, ((0, n_pad), (0, 0)))
    m_total = (n + n_pad) // BLK
    x_packed = x.reshape(m_total, BLK * 2)  # contiguous view, no relayout

    # Block-diagonal weights: one independent (2,H)/(H,D) block per packed
    # sample slot, so both layers are single lane-dense matmuls.  Tiny, built
    # once per call under jit.
    eye = jnp.eye(BLK, dtype=jnp.float32)
    w1_blk = jnp.kron(eye, w1.astype(jnp.float32))                   # (2*BLK, BLK*H)
    w2_blk = jnp.kron(eye, w2.astype(jnp.float32))                   # (BLK*H, BLK*D)
    b1_blk = jnp.tile(b1.astype(jnp.float32), BLK).reshape(1, BLK * hidden_dim)
    b2_blk = jnp.tile(b2.astype(jnp.float32), BLK).reshape(1, BLK * head_dim)

    # Packed-row tile size: large to amortize per-step overhead; clamp to the
    # array, and keep non-spanning blocks a multiple of 8 (sublane rule).
    tile_m = max(1, min(tile_n // BLK, m_total))
    if tile_m < m_total:
        tile_m = max(8, (tile_m // 8) * 8)
    grid_m = pl.cdiv(m_total, tile_m)  # last block may over-hang: stores masked

    out_packed = pl.pallas_call(
        _spatial_encoder_kernel,
        out_shape=jax.ShapeDtypeStruct((m_total, BLK * head_dim), state.dtype),
        grid_spec=pltpu.PrefetchScalarGridSpec(
            num_scalar_prefetch=0,
            grid=(grid_m,),
            in_specs=[
                pl.BlockSpec((tile_m, BLK * 2), lambda i: (i, 0)),                   # x
                pl.BlockSpec((BLK * 2, BLK * hidden_dim), lambda i: (0, 0)),         # W1 blk
                pl.BlockSpec((1, BLK * hidden_dim), lambda i: (0, 0)),               # b1 blk
                pl.BlockSpec((BLK * hidden_dim, BLK * head_dim), lambda i: (0, 0)),  # W2 blk
                pl.BlockSpec((1, BLK * head_dim), lambda i: (0, 0)),                 # b2 blk
            ],
            out_specs=pl.BlockSpec((tile_m, BLK * head_dim), lambda i: (i, 0)),
        ),
        compiler_params=pltpu.CompilerParams(
            dimension_semantics=("parallel",),  # shard grid axis across TCs (v7x)
        ),
    )(x_packed, w1_blk, b1_blk, w2_blk, b2_blk)

    out = out_packed.reshape(m_total * BLK, head_dim)  # contiguous view
    if n_pad:
        out = out[:n]
    return out.reshape(*lead, head_dim)


def init_params(key, hidden_dim, head_dim, dtype=jnp.float32):
    """Deterministic parameter init (shapes match nn.Linear(2,H), nn.Linear(H,D))."""
    k1, k2, k3, k4 = jax.random.split(key, 4)
    # stored transposed relative to torch's (out, in): here (in, out) for x @ W
    w1 = jax.random.uniform(k1, (2, hidden_dim), dtype, -0.5, 0.5)
    b1 = jax.random.uniform(k2, (hidden_dim,), dtype, -0.5, 0.5)
    w2 = jax.random.uniform(k3, (hidden_dim, head_dim), dtype, -0.1, 0.1)
    b2 = jax.random.uniform(k4, (head_dim,), dtype, -0.1, 0.1)
    return w1, b1, w2, b2


def reference(state, w1, b1, w2, b2):
    h = jnp.maximum(state @ w1 + b1, 0.0)
    return h @ w2 + b2


if __name__ == "__main__":
    hidden_dim = 32
    head_dim = 16

    key = jax.random.PRNGKey(0)
    k_state, k_params = jax.random.split(key)

    # state: (batch=8, num_samples=16, 2) sampled locations
    state = jax.random.normal(k_state, (8, 16, 2), dtype=jnp.float32)
    w1, b1, w2, b2 = init_params(k_params, hidden_dim, head_dim)

    out = spatial_encoder(state, w1, b1, w2, b2)
    out = jax.block_until_ready(out)

    ref = reference(state, w1, b1, w2, b2)
    assert out.shape == (8, 16, head_dim), out.shape
    assert jnp.allclose(out, ref, atol=1e-5, rtol=1e-5), "mismatch vs reference"

    print("KERNEL_OK")
</pallas_src>

<mosaic_0001>
module attributes {stable_mosaic.version = 11 : i64} {
  func.func @_spatial_encoder_kernel(%arg0: i32, %arg1: memref<16x16xf32, #tpu.memory_space<vmem>>, %arg2: memref<16x256xf32, #tpu.memory_space<vmem>>, %arg3: memref<1x256xf32, #tpu.memory_space<vmem>>, %arg4: memref<256x128xf32, #tpu.memory_space<vmem>>, %arg5: memref<1x128xf32, #tpu.memory_space<vmem>>, %arg6: memref<16x128xf32, #tpu.memory_space<vmem>>) attributes {dimension_semantics = [#tpu.dimension_semantics<parallel>], iteration_bounds = array<i64: 1>, scalar_prefetch = 0 : i64, scratch_operands = 0 : i64, tpu.core_type = #tpu.core_type<tc>, window_params = [{transform_indices = @transform_0, window_bounds = array<i64: 16, 16>}, {pipeline_mode = #tpu.pipeline_mode<synchronous>, transform_indices = @transform_1, window_bounds = array<i64: 16, 256>}, {pipeline_mode = #tpu.pipeline_mode<synchronous>, transform_indices = @transform_2, window_bounds = array<i64: 1, 256>}, {pipeline_mode = #tpu.pipeline_mode<synchronous>, transform_indices = @transform_3, window_bounds = array<i64: 256, 128>}, {pipeline_mode = #tpu.pipeline_mode<synchronous>, transform_indices = @transform_4, window_bounds = array<i64: 1, 128>}, {transform_indices = @transform_5, window_bounds = array<i64: 16, 128>}]} {
    %c0 = arith.constant 0 : index
    %c0_0 = arith.constant 0 : index
    %0 = vector.load %arg1[%c0, %c0_0] : memref<16x16xf32, #tpu.memory_space<vmem>>, vector<16x16xf32>
    %c0_1 = arith.constant 0 : index
    %c0_2 = arith.constant 0 : index
    %1 = vector.load %arg2[%c0_1, %c0_2] : memref<16x256xf32, #tpu.memory_space<vmem>>, vector<16x256xf32>
    %cst = arith.constant dense<0.000000e+00> : vector<16x256xf32>
    %2 = tpu.matmul %0, %1, %cst {dimension_numbers = #tpu.dot_dimension_numbers<[1], [0], [0], [1], [0, 0, 1, 1], [], []>} : vector<16x16xf32>, vector<16x256xf32>, vector<16x256xf32> -> vector<16x256xf32>
    %c0_3 = arith.constant 0 : index
    %c0_4 = arith.constant 0 : index
    %3 = vector.load %arg3[%c0_3, %c0_4] : memref<1x256xf32, #tpu.memory_space<vmem>>, vector<1x256xf32>
    %4 = vector.broadcast %3 : vector<1x256xf32> to vector<16x256xf32>
    %5 = arith.addf %2, %4 : vector<16x256xf32>
    %cst_5 = arith.constant 0.000000e+00 : f32
    %6 = vector.broadcast %cst_5 : f32 to vector<16x256xf32>
    %7 = arith.maximumf %5, %6 : vector<16x256xf32>
    %c0_6 = arith.constant 0 : index
    %c0_7 = arith.constant 0 : index
    %8 = vector.load %arg4[%c0_6, %c0_7] : memref<256x128xf32, #tpu.memory_space<vmem>>, vector<256x128xf32>
    %cst_8 = arith.constant dense<0.000000e+00> : vector<16x128xf32>
    %9 = tpu.matmul %7, %8, %cst_8 {dimension_numbers = #tpu.dot_dimension_numbers<[1], [0], [0], [1], [0, 0, 1, 1], [], []>} : vector<16x256xf32>, vector<256x128xf32>, vector<16x128xf32> -> vector<16x128xf32>
    %c0_9 = arith.constant 0 : index
    %c0_10 = arith.constant 0 : index
    %10 = vector.load %arg5[%c0_9, %c0_10] : memref<1x128xf32, #tpu.memory_space<vmem>>, vector<1x128xf32>
    %11 = vector.broadcast %10 : vector<1x128xf32> to vector<16x128xf32>
    %12 = arith.addf %9, %11 : vector<16x128xf32>
    %c0_11 = arith.constant 0 : index
    %c0_12 = arith.constant 0 : index
    %13 = vector.load %arg6[%c0_11, %c0_12] : memref<16x128xf32, #tpu.memory_space<vmem>>, vector<16x128xf32>
    tpu.vector_store %arg6[%c0_11, %c0_12], %12 {strides = array<i32>} : memref<16x128xf32, #tpu.memory_space<vmem>>, vector<16x128xf32>,
    return
  }
  func.func @transform_0(%arg0: i32) -> (i32, i32) {
    %c0_i32 = arith.constant 0 : i32
    %c0_i32_0 = arith.constant 0 : i32
    return %arg0, %c0_i32 : i32, i32
  }
  func.func @transform_1(%arg0: i32) -> (i32, i32) {
    %c0_i32 = arith.constant 0 : i32
    %c0_i32_0 = arith.constant 0 : i32
    %c0_i32_1 = arith.constant 0 : i32
    return %c0_i32, %c0_i32_0 : i32, i32
  }
  func.func @transform_2(%arg0: i32) -> (i32, i32) {
    %c0_i32 = arith.constant 0 : i32
    %c0_i32_0 = arith.constant 0 : i32
    %c0_i32_1 = arith.constant 0 : i32
    return %c0_i32, %c0_i32_0 : i32, i32
  }
  func.func @transform_3(%arg0: i32) -> (i32, i32) {
    %c0_i32 = arith.constant 0 : i32
    %c0_i32_0 = arith.constant 0 : i32
    %c0_i32_1 = arith.constant 0 : i32
    return %c0_i32, %c0_i32_0 : i32, i32
  }
  func.func @transform_4(%arg0: i32) -> (i32, i32) {
    %c0_i32 = arith.constant 0 : i32
    %c0_i32_0 = arith.constant 0 : i32
    %c0_i32_1 = arith.constant 0 : i32
    return %c0_i32, %c0_i32_0 : i32, i32
  }
  func.func @transform_5(%arg0: i32) -> (i32, i32) {
    %c0_i32 = arith.constant 0 : i32
    %c0_i32_0 = arith.constant 0 : i32
    return %arg0, %c0_i32 : i32, i32
  }
}

</mosaic_0001>

<bundles_post_ra>
// kernel: tile.13
= control target key start
LH: loop header
LB: loop body
LE: loop exit
PB: predicated region body
PF: predicated region fallthrough
CT: control target
= control target key end

     0   :  { %s22_s0 = inlined_call_operand.vmem [shape: f32[32], index: 0, kind: input, shape index: {}]   ;;  %s23_s1 = inlined_call_operand.vmem [shape: f32[8,32], index: 1, kind: output, shape index: {}]  }
   0x1   :  { %v4_v0 = vld [vmem:[%s22_s0] ss:$0 sm:$0xff] }
   0x2   :  { %5 = vst [vmem:[%s23_s1] sm:$0xff] %v4_v0 }

// kernel: tile.14
= control target key start
LH: loop header
LB: loop body
LE: loop exit
PB: predicated region body
PF: predicated region fallthrough
CT: control target
= control target key end

     0   :  { %s7_s6 = smov 3  ;;  %s14_s9 = smov 3  ;;  %vm4_vm0 = vcmask 261120   ;;  %vm11_vm1 = vcmask 1048320   ;;  %vm18_vm2 = vcmask 785920   ;;  %vm25_vm3 = vcmask 523520   ;;  %s76_s0 = inlined_call_operand.vmem [shape: f32[8,32], index: 0, kind: input, shape index: {}]   ;;  %s77_s1 = inlined_call_operand.vmem [shape: f32[1,256], index: 1, kind: output, shape index: {}]  }
   0x1   :  { %v38_v0 = vld [vmem:[%s76_s0 + $0x3] ss:$4 sm:%s7_s6]   ;;  %s45_s10 = smov 96   ;;  %s21_s11 = smov 3  ;;  %v39_v1 = vld [vmem:[%s76_s0 + $0x2] ss:$4 sm:%s14_s9]  }
   0x2   :  { %9 = vrot.lane.b32.xlu0 %v38_v0, %s45_s10  ;;  %v40_v2 = vld [vmem:[%s76_s0 + $0x1] ss:$4 sm:%s21_s11]   ;;  %s2_s16 = smov 3  ;;  %s46_s17 = smov 32  }
   0x3   :  { %23 = vrot.lane.b32.xlu1 %v40_v2, %s46_s17  ;;  %v3_v3 = vld [vmem:[%s76_s0] ss:$4 sm:%s2_s16]   ;;  %s47_s0 = smov 64  }
   0x4   :  { %5 = vst.msk [vmem:[#allocation0] ss:$8 sm:$0x3] %vm4_vm0, %v3_v3  }
   0x6   :  { %16 = vrot.lane.b32.xlu0 %v39_v1, %s47_s0 }
  0x74   :  { %v10_v4 = vpop.permute.xlu0 %9  }
  0x75   :  { %12 = vst.msk [vmem:[#allocation0] ss:$8 sm:$0x3] %vm11_vm1, %v10_v4   ;;  %v24_v5 = vpop.permute.xlu1 %23  }
  0x78   :  { %v17_v6 = vpop.permute.xlu0 %16  }
  0x79   :  { %19 = vst.msk [vmem:[#allocation0] ss:$8 sm:$0x3] %vm18_vm2, %v17_v6  }
  0x7a   :  { %26 = vst.msk [vmem:[#allocation0] ss:$8 sm:$0x3] %vm25_vm3, %v24_v5  }
  0x81   :  { %v30_v7 = vld [vmem:[#allocation0] sm:$0x1]  ;;  %v34_v8 = vld [vmem:[#allocation0 + $0x8] sm:$0x1] }
  0x82   :  { %32 = vst [vmem:[%s77_s1] sm:$0x1] %v30_v7  ;;  %41 = vst [vmem:[%s77_s1 + $0x1] sm:$0x1] %v34_v8 }

// kernel: tile.18
= control target key start
LH: loop header
LB: loop body
LE: loop exit
PB: predicated region body
PF: predicated region fallthrough
CT: control target
= control target key end

     0   :  { %s22_s0 = inlined_call_operand.vmem [shape: f32[16], index: 0, kind: input, shape index: {}]   ;;  %s23_s1 = inlined_call_operand.vmem [shape: f32[8,16], index: 1, kind: output, shape index: {}]  }
   0x1   :  { %v4_v0 = vld [vmem:[%s22_s0] ss:$0 sm:$0xff] }
   0x2   :  { %5 = vst [vmem:[%s23_s1] sm:$0xff] %v4_v0 }

// kernel: tile.19
= control target key start
LH: loop header
LB: loop body
LE: loop exit
PB: predicated region body
PF: predicated region fallthrough
CT: control target
= control target key end

     0   :  { %s67_s10 = smov 112   ;;  %s68_s11 = smov 80   ;;  %vm3_vm0 = vcmask 130048   ;;  %vm9_vm1 = vcmask 1048448   ;;  %vm15_vm2 = vcmask 917248   ;;  %vm21_vm3 = vcmask 786048   ;;  %s111_s0 = inlined_call_operand.vmem [shape: f32[8,16], index: 0, kind: input, shape index: {}]   ;;  %s112_s1 = inlined_call_operand.vmem [shape: f32[1,128], index: 1, kind: output, shape index: {}]  }
   0x1   :  { %v53_v0 = vld [vmem:[%s111_s0 + $0x7] sm:$0x1]   ;;  %v55_v1 = vld [vmem:[%s111_s0 + $0x5] sm:$0x1]   ;;  %v54_v2 = vld [vmem:[%s111_s0 + $0x6] sm:$0x1]  }
   0x2   :  { %7 = vrot.lane.b32.xlu0 %v53_v0, %s67_s10  ;;  %19 = vrot.lane.b32.xlu1 %v55_v1, %s68_s11  ;;  %v56_v3 = vld [vmem:[%s111_s0 + $0x4] sm:$0x1]   ;;  %v2_v4 = vld [vmem:[%s111_s0] sm:$0x1]   ;;  %s69_s18 = smov 96   ;;  %s70_s19 = smov 64  }
   0x3   :  { %4 = vst.msk [vmem:[#allocation0] sm:$0x1] %vm3_vm0, %v2_v4   ;;  %v57_v5 = vld [vmem:[%s111_s0 + $0x3] sm:$0x1]   ;;  %v58_v6 = vld [vmem:[%s111_s0 + $0x2] sm:$0x1]  }
   0x4   :  { %s71_s24 = smov 48   ;;  %s72_s25 = smov 32   ;;  %v59_v7 = vld [vmem:[%s111_s0 + $0x1] sm:$0x1]   ;;  %vm27_vm4 = vcmask 654848   ;;  %vm33_vm5 = vcmask 523648  }
   0x5   :  { %s73_s0 = smov 16   ;;  %vm39_vm6 = vcmask 392448   ;;  %vm45_vm7 = vcmask 261248  }
   0x6   :  { %13 = vrot.lane.b32.xlu0 %v54_v2, %s69_s18  ;;  %25 = vrot.lane.b32.xlu1 %v56_v3, %s70_s19 }
   0xa   :  { %31 = vrot.lane.b32.xlu0 %v57_v5, %s71_s24  ;;  %37 = vrot.lane.b32.xlu1 %v58_v6, %s72_s25 }
   0xe   :  { %43 = vrot.lane.b32.xlu0 %v59_v7, %s73_s0 }
  0x74   :  { %v8_v8 = vpop.permute.xlu0 %7   ;;  %v20_v9 = vpop.permute.xlu1 %19  }
  0x75   :  { %10 = vst.msk [vmem:[#allocation0] sm:$0x1] %vm9_vm1, %v8_v8  }
  0x78   :  { %v14_v10 = vpop.permute.xlu0 %13   ;;  %v26_v11 = vpop.permute.xlu1 %25  }
  0x79   :  { %16 = vst.msk [vmem:[#allocation0] sm:$0x1] %vm15_vm2, %v14_v10  }
  0x7a   :  { %22 = vst.msk [vmem:[#allocation0] sm:$0x1] %vm21_vm3, %v20_v9  }
  0x7b   :  { %28 = vst.msk [vmem:[#allocation0] sm:$0x1] %vm27_vm4, %v26_v11  }
  0x7c   :  { %v32_v12 = vpop.permute.xlu0 %31   ;;  %v38_v13 = vpop.permute.xlu1 %37  }
  0x7d   :  { %34 = vst.msk [vmem:[#allocation0] sm:$0x1] %vm33_vm5, %v32_v12  }
  0x7e   :  { %40 = vst.msk [vmem:[#allocation0] sm:$0x1] %vm39_vm6, %v38_v13  }
  0x80   :  { %v44_v14 = vpop.permute.xlu0 %43  }
  0x81   :  { %46 = vst.msk [vmem:[#allocation0] sm:$0x1] %vm45_vm7, %v44_v14  }
  0x88   :  { %v50_v15 = vld [vmem:[#allocation0] sm:$0x1] }
  0x89   :  { %52 = vst [vmem:[%s112_s1] sm:$0x1] %v50_v15 }

// kernel: spatial_encoder.1
= control target key start
LH: loop header
LB: loop body
LE: loop exit
PB: predicated region body
PF: predicated region fallthrough
CT: control target
= control target key end

     0   :  { %v324_v3 = vmov 0.0   ;;  %vm38_vm0 = vcmask 130048   ;;  %v28_v57 = vlaneseq  ;;  %s483_s1 = inlined_call_operand.vmem [shape: f32[16,256], index: 1, kind: input, shape index: {}]   ;;  %s484_s0 = inlined_call_operand.vmem [shape: f32[16,16], index: 0, kind: input, shape index: {}]   ;;  %s485_s3 = inlined_call_operand.vmem [shape: f32[256,128], index: 3, kind: input, shape index: {}]   ;;  %s486_s2 = inlined_call_operand.vmem [shape: f32[1,256], index: 2, kind: input, shape index: {}]   ;;  %s487_s4 = inlined_call_operand.vmem [shape: f32[1,128], index: 4, kind: input, shape index: {}]   ;;  %s488_s5 = inlined_call_operand.vmem [shape: f32[16,128], index: 5, kind: output, shape index: {}]  }
   0x1   :  { %v23_v0 = vld [vmem:[%s483_s1 + $0x8] sm:$0xff]  ;;  %v25_v1 = vld [vmem:[%s483_s1 + $0x18] sm:$0xff]  ;;  %v22_v2 = vld [vmem:[%s483_s1] sm:$0xff]  ;;  %109 = vmatprep.mubr.f32.mxu0 %v324_v3 }
   0x2   :  { %v287_v4 = vpack.c.bf16 %v25_v1, %v23_v0  ;;  %v24_v5 = vld [vmem:[%s483_s1 + $0x10] sm:$0xff]  ;;  %v20_v7 = vld [vmem:[%s484_s0] sm:$0xff]  ;;  %v143_v9 = vld [vmem:[%s485_s3 + $0x88] sm:$0xff]  ;;  %v29_v58 = vshrl.u32 %v28_v57, 7 }
   0x3   :  { %v289_v6 = vpack.c.bf16 %v24_v5, %v22_v2  ;;  %v142_v8 = vld [vmem:[%s485_s3 + $0x80] sm:$0xff]  ;;  %v127_v12 = vld [vmem:[%s485_s3 + $0x8] sm:$0xff]  ;;  %v144_v13 = vld [vmem:[%s485_s3 + $0x90] sm:$0xff] }
   0x4   :  { %v126_v10 = vld [vmem:[%s485_s3] sm:$0xff]  ;;  %288 = vmatprep.subr.bf16.mxu0 %v287_v4  ;;  %v291_v11 = vpack.c.bf16 %v143_v9, %v142_v8  ;;  %v145_v14 = vld [vmem:[%s485_s3 + $0x98] sm:$0xff]  ;;  %v128_v17 = vld [vmem:[%s485_s3 + $0x10] sm:$0xff]  ;;  %v30_v59 = vsub.s32 0, %v29_v58  ;;  %v34_v61 = vsub.s32 1, %v29_v58 }
   0x5   :  { %290 = vmatpush1.bf16.msra.mxu0 %v289_v6  ;;  %v293_v15 = vpack.c.bf16 %v127_v12, %v126_v10  ;;  %v295_v16 = vpack.c.bf16 %v145_v14, %v144_v13  ;;  %v129_v18 = vld [vmem:[%s485_s3 + $0x18] sm:$0xff]  ;;  %v146_v19 = vld [vmem:[%s485_s3 + $0xa0] sm:$0xff]  ;;  %v147_v20 = vld [vmem:[%s485_s3 + $0xa8] sm:$0xff] }
   0x6   :  { %292 = vmatprep.subr.bf16.mxu1 %v291_v11  ;;  %v297_v21 = vpack.c.bf16 %v129_v18, %v128_v17  ;;  %v299_v22 = vpack.c.bf16 %v147_v20, %v146_v19  ;;  %v130_v23 = vld [vmem:[%s485_s3 + $0x20] sm:$0xff]  ;;  %v131_v24 = vld [vmem:[%s485_s3 + $0x28] sm:$0xff]  ;;  %v148_v26 = vld [vmem:[%s485_s3 + $0xb0] sm:$0xff] }
   0x7   :  { %294 = vmatpush3.bf16.msra.mxu1 %v293_v15  ;;  %v21_v25 = vld [vmem:[%s484_s0 + $0x8] sm:$0xff]  ;;  %v149_v27 = vld [vmem:[%s485_s3 + $0xb8] sm:$0xff]  ;;  %v301_v28 = vpack.c.bf16 %v131_v24, %v130_v23  ;;  %v132_v30 = vld [vmem:[%s485_s3 + $0x30] sm:$0xff] }
   0x8   :  { %246 = vmatmul.mubr.msk.f32.vlgmr.msra.gmra.mrb[0].mxu0 %vm38_vm0, %v20_v7  ;;  %296 = vmatprep.subr.bf16.mxu1 %v295_v16  ;;  %v303_v29 = vpack.c.bf16 %v149_v27, %v148_v26  ;;  %v133_v31 = vld [vmem:[%s485_s3 + $0x38] sm:$0xff]  ;;  %v150_v32 = vld [vmem:[%s485_s3 + $0xc0] sm:$0xff]  ;;  %v151_v33 = vld [vmem:[%s485_s3 + $0xc8] sm:$0xff] }
   0x9   :  { %115 = vmatprep.mubr.f32.mxu0 %v324_v3  ;;  %v305_v34 = vpack.c.bf16 %v133_v31, %v132_v30  ;;  %v307_v35 = vpack.c.bf16 %v151_v33, %v150_v32  ;;  %v134_v36 = vld [vmem:[%s485_s3 + $0x40] sm:$0xff]  ;;  %v135_v37 = vld [vmem:[%s485_s3 + $0x48] sm:$0xff]  ;;  %v152_v38 = vld [vmem:[%s485_s3 + $0xd0] sm:$0xff] }
   0xa   :  { %v153_v39 = vld [vmem:[%s485_s3 + $0xd8] sm:$0xff]  ;;  %v309_v40 = vpack.c.bf16 %v135_v37, %v134_v36  ;;  %v136_v42 = vld [vmem:[%s485_s3 + $0x50] sm:$0xff]  ;;  %v154_v44 = vld [vmem:[%s485_s3 + $0xe0] sm:$0xff] }
   0xb   :  { %298 = vmatpush3.bf16.msra.mxu1 %v297_v21  ;;  %v311_v41 = vpack.c.bf16 %v153_v39, %v152_v38  ;;  %v137_v43 = vld [vmem:[%s485_s3 + $0x58] sm:$0xff]  ;;  %v155_v45 = vld [vmem:[%s485_s3 + $0xe8] sm:$0xff]  ;;  %v138_v48 = vld [vmem:[%s485_s3 + $0x60] sm:$0xff] }
   0xc   :  { %247 = vmatmul.mubr.msk.f32.gmra.mrb[2].mxu0 %vm38_vm0, %v21_v25  ;;  %300 = vmatprep.subr.bf16.mxu1 %v299_v22  ;;  %v313_v46 = vpack.c.bf16 %v137_v43, %v136_v42  ;;  %v315_v47 = vpack.c.bf16 %v155_v45, %v154_v44  ;;  %v139_v49 = vld [vmem:[%s485_s3 + $0x68] sm:$0xff]  ;;  %v156_v51 = vld [vmem:[%s485_s3 + $0xf0] sm:$0xff]  ;;  %v157_v52 = vld [vmem:[%s485_s3 + $0xf8] sm:$0xff] }
   0xd   :  { %v317_v50 = vpack.c.bf16 %v139_v49, %v138_v48  ;;  %v319_v53 = vpack.c.bf16 %v157_v52, %v156_v51  ;;  %v140_v54 = vld [vmem:[%s485_s3 + $0x70] sm:$0xff]  ;;  %v141_v55 = vld [vmem:[%s485_s3 + $0x78] sm:$0xff]  ;;  %v26_v60 = vld [vmem:[%s486_s2] sm:$0x3] }
   0xe   :  { %v321_v56 = vpack.c.bf16 %v141_v55, %v140_v54  ;;  %v31_v62 = vrot.slane %v26_v60, %v30_v59  ;;  %v35_v63 = vrot.slane %v26_v60, %v34_v61  ;;  %v248_v13 = vld [vmem:[%s487_s4] ss:$0 sm:$0xff] }
   0xf   :  { %302 = vmatpush3.bf16.msra.mxu1 %v301_v28 }
  0x10   :  { %304 = vmatprep.subr.bf16.mxu1 %v303_v29 }
  0x13   :  { %306 = vmatpush3.bf16.msra.mxu1 %v305_v34 }
  0x14   :  { %308 = vmatprep.subr.bf16.mxu1 %v307_v35 }
  0x17   :  { %310 = vmatpush3.bf16.msra.mxu1 %v309_v40 }
  0x18   :  { %312 = vmatprep.subr.bf16.mxu1 %v311_v41 }
  0x1b   :  { %314 = vmatpush3.bf16.msra.mxu1 %v313_v46 }
  0x1c   :  { %316 = vmatprep.subr.bf16.mxu1 %v315_v47 }
  0x1f   :  { %318 = vmatpush3.bf16.msra.mxu1 %v317_v50 }
  0x20   :  { %320 = vmatprep.subr.bf16.mxu1 %v319_v53 }
  0x23   :  { %322 = vmatpush3.bf16.msra.mxu1 %v321_v56 }
  0xdb   :  { %v111_v0 = vpop.f32.mrb[0].mxu0 }
  0xdc   :  { %v112_v1 = vadd.f32 %v111_v0, %v31_v62  ;;  %v113_v2 = vpop.f32.mrb[1].mxu0 }
  0xdd   :  { %v114_v3 = vadd.f32 %v113_v2, %v35_v63 }
  0xde   :  { %v122_v6 = vmax.f32 %v112_v1, 0.0 }
  0xdf   :  { %v117_v4 = vpop.f32.mrb[2].mxu0  ;;  %v123_v5 = vmax.f32 %v114_v3, 0.0 }
  0xe0   :  { %v118_v7 = vadd.f32 %v117_v4, %v31_v62  ;;  %v119_v8 = vpop.f32.mrb[3].mxu0 }
  0xe1   :  { %v120_v9 = vadd.f32 %v119_v8, %v35_v63  ;;  %229 = vmatprep.mubr.f32.mxu1 %v123_v5 }
  0xe2   :  { %230 = vmatmul.mubr.f32.vlgmr.msra.gmra.mrb[0].mxu1 %v122_v6  ;;  %v124_v11 = vmax.f32 %v118_v7, 0.0 }
  0xe3   :  { %v125_v10 = vmax.f32 %v120_v9, 0.0 }
  0xe5   :  { %234 = vmatprep.mubr.f32.mxu1 %v125_v10 }
  0xe6   :  { %235 = vmatmul.mubr.f32.gmra.mrb[2].mxu1 %v124_v11 }
 0x1b5   :  { %v281_v12 = vpop.f32.mrb[0].mxu1 }
 0x1b6   :  { %v282_v14 = vpop.f32.mrb[1].mxu1 }
 0x1b7   :  { %v283_v15 = vadd.f32 %v282_v14, %v281_v12 }
 0x1b9   :  { %v232_v16 = vadd.f32 %v283_v15, %v248_v13  ;;  %v284_v17 = vpop.f32.mrb[2].mxu1 }
 0x1ba   :  { %v285_v18 = vpop.f32.mrb[3].mxu1 }
 0x1bb   :  { %240 = vst [vmem:[%s488_s5] sm:$0xff] %v232_v16  ;;  %v286_v19 = vadd.f32 %v285_v18, %v284_v17 }
 0x1bd   :  { %v237_v20 = vadd.f32 %v286_v19, %v248_v13 }
 0x1bf   :  { %241 = vst [vmem:[%s488_s5 + $0x8] sm:$0xff] %v237_v20 }

</bundles_post_ra>
